<compile_context>
chip_gen: v7x
topology: tpu7x:2x2x1
jax: 0.10.0
libtpu: 0.0.40
codegen_flags: <defaults>
</compile_context>

<pallas_src>
import functools

import jax
import jax.numpy as jnp
from jax.experimental import pallas as pl
from jax.experimental.pallas import tpu as pltpu


def _round_up(v, m):
    return ((v + m - 1) // m) * m


def _ln_head_kernel(x_ref, gamma_ref, beta_ref, w_ref, b_ref, o_ref, xn_ref, *, eps):
    # Grid = (row tiles i ["parallel"], column tiles j ["arbitrary"]); j iterates fastest.
    # x_ref:     (tm, D)   current row tile (re-used across j, not re-fetched)
    # gamma_ref: (1, D)    LayerNorm scale (f32)
    # beta_ref:  (1, D)    LayerNorm shift (f32)
    # w_ref:     (D, tn)   head weight column tile (native dtype; bf16 hits MXU natively)
    # b_ref:     (1, tn)   head bias tile (f32, padded)
    # o_ref:     (tm, tn)  output tile
    # xn_ref:    (tm, D)   VMEM scratch: LayerNorm'd tile cached across the j axis

    @pl.when(pl.program_id(1) == 0)
    def _():
        # LayerNorm over the feature axis in f32 (matches torch.nn.LayerNorm: biased
        # variance, eps inside the rsqrt). Done once per row tile, then cached.
        x = x_ref[...].astype(jnp.float32)
        mean = jnp.mean(x, axis=-1, keepdims=True)
        xc = x - mean
        var = jnp.mean(xc * xc, axis=-1, keepdims=True)
        inv = jax.lax.rsqrt(var + eps)
        xn = xc * inv * gamma_ref[...] + beta_ref[...]
        xn_ref[...] = xn.astype(xn_ref.dtype)

    # Head matmul on the MXU: operands in the weight's native dtype, f32 accumulation.
    y = jnp.dot(xn_ref[...], w_ref[...], preferred_element_type=jnp.float32)
    o_ref[...] = (y + b_ref[...]).astype(o_ref.dtype)


def prepare_linear_params(gamma, beta, weight, bias, *, c_align=128,
                          mxu_dtype=jnp.bfloat16):
    """One-time parameter prep, hoisted out of the per-call path.

    weight: (num_classes, D) torch convention. Returns the transposed, lane-padded
    weight (D, C_pad), padded f32 bias, and f32 gamma/beta. The head weight is stored
    in `mxu_dtype` (default bf16 = MXU-native; pass jnp.float32 / None to keep f32).
    """
    C, D = weight.shape
    C_pad = _round_up(C, c_align)
    w_t = weight.T                                  # (D, C)
    if mxu_dtype is not None:
        w_t = w_t.astype(mxu_dtype)
    bias_f32 = bias.astype(jnp.float32)
    if C_pad != C:
        w_t = jnp.pad(w_t, ((0, 0), (0, C_pad - C)))
        bias_f32 = jnp.pad(bias_f32, (0, C_pad - C))
    return dict(
        gamma=gamma.astype(jnp.float32).reshape(1, D),
        beta=beta.astype(jnp.float32).reshape(1, D),
        w_t=w_t,                                    # (D, C_pad)
        bias=bias_f32.reshape(1, C_pad),            # (1, C_pad) f32
        num_classes=C,
    )


def _physical_vmem_bytes():
    """Per-TensorCore VMEM capacity; conservative 64 MiB (v7x) if the query fails."""
    try:
        info = pltpu.get_tpu_info()
        cap = getattr(info, "vmem_capacity_bytes", None)
        if cap:
            return int(cap)
    except Exception:
        pass
    return 64 * (1 << 20)


def _vmem_bytes_estimate(tm, tn, D, x_dtype, w_dtype, out_dtype):
    """Honest working-set model: pipeline buffers + compute temporaries."""
    xb = jnp.dtype(x_dtype).itemsize
    wb = jnp.dtype(w_dtype).itemsize
    ob = jnp.dtype(out_dtype).itemsize
    return (2 * tm * D * xb           # x row tile, double-buffered
            + 2 * D * tn * wb         # weight column tile, double-buffered
            + 2 * tm * tn * ob        # output tile, double-buffered
            + tm * D * wb             # cached normalized tile (scratch)
            + 3 * tm * D * 4          # f32 upcast + centered / normalized temporaries
            + tm * tn * 4             # f32 matmul accumulator
            + 2 * (2 * D + tn) * 4)   # gamma / beta / bias buffers


def linear_head_forward(x, params, *, eps=1e-5, tm=None, tn=None):
    """x: (..., D). params: output of prepare_linear_params. Returns (..., num_classes)."""
    orig_shape = x.shape
    D = orig_shape[-1]
    x2d = x.reshape(-1, D)
    M = x2d.shape[0]

    gamma2, beta2 = params["gamma"], params["beta"]
    w_t, bias2 = params["w_t"], params["bias"]
    C = params["num_classes"]
    C_pad = w_t.shape[1]

    # ---- row tile (sublane-aligned, clamped to M) -----------------------------------
    row_align = 16 if (x2d.dtype == jnp.bfloat16 or w_t.dtype == jnp.bfloat16) else 8
    if tm is None:
        tm = 1024 if x2d.dtype == jnp.bfloat16 else 512
    if M <= row_align:
        tm = M
    else:
        tm = min(tm, M)
        tm = max(row_align, (tm // row_align) * row_align)

    # ---- column tile: lane-dense multiple of 128, 256-floor for 256-wide MXUs --------
    lane_floor = 256 if C_pad >= 256 else 128
    if tn is None:
        tn = max(lane_floor, (min(C_pad, 512) // 128) * 128)
    else:
        tn = max(128, (min(tn, C_pad) // 128) * 128)
    tn = min(tn, C_pad)
    tn_floor = min(lane_floor, tn)

    # ---- generation-aware VMEM budget; shrink tn before tm ---------------------------
    phys = _physical_vmem_bytes()
    budget = max(6 << 20, int(phys * 0.35))   # ~22 MiB on v7x (64 MiB), ~45 MiB on v5e/v6e
    while _vmem_bytes_estimate(tm, tn, D, x2d.dtype, w_t.dtype, x2d.dtype) > budget:
        if tn > tn_floor:
            # Weight HBM traffic is (M/tm)*D*C_pad -> independent of tn; shrink tn first.
            tn = max(tn_floor, (tn // 2 // 128) * 128)
        elif tm > row_align:
            tm = max(row_align, (tm // 2 // row_align) * row_align)
        else:
            break

    # Guarantee >= 2 row tiles (v7x dual TensorCore) whenever M allows.
    while pl.cdiv(M, tm) < 2 and tm > row_align:
        tm = max(row_align, (tm // 2 // row_align) * row_align)

    # ---- output layout ----------------------------------------------------------------
    # Wide heads: write (M, C) directly; only the final partial column tile uses a masked
    # store, and the external M x C_pad -> M x C slicing pass disappears.
    # Narrow heads (C < 128 or C < tn): keep lane-dense padded output + cheap slice.
    use_direct = (C >= 128) and (tn <= C)
    out_cols = C if use_direct else C_pad

    n_i = pl.cdiv(M, tm)
    n_j = pl.cdiv(out_cols, tn)   # equals pl.cdiv(C_pad, tn)

    est = _vmem_bytes_estimate(tm, tn, D, x2d.dtype, w_t.dtype, x2d.dtype)
    vmem_limit = int(max(32 << 20, min(phys - (2 << 20), est + (8 << 20))))

    cost = pl.CostEstimate(
        flops=2 * M * D * C_pad,
        transcendentals=M,   # one rsqrt per row (LayerNorm cached across the j axis)
        bytes_accessed=int(M * D * x2d.dtype.itemsize
                           + n_i * D * C_pad * jnp.dtype(w_t.dtype).itemsize  # re-streamed
                           + n_i * C_pad * 4                                   # bias
                           + M * out_cols * x2d.dtype.itemsize),               # output
    )

    out2d = pl.pallas_call(
        functools.partial(_ln_head_kernel, eps=eps),
        out_shape=jax.ShapeDtypeStruct((M, out_cols), x2d.dtype),
        grid_spec=pltpu.PrefetchScalarGridSpec(
            num_scalar_prefetch=0,
            grid=(n_i, n_j),
            in_specs=[
                pl.BlockSpec((tm, D), lambda i, j: (i, 0)),   # x row tile (constant in j)
                pl.BlockSpec((1, D), lambda i, j: (0, 0)),    # gamma
                pl.BlockSpec((1, D), lambda i, j: (0, 0)),    # beta
                pl.BlockSpec((D, tn), lambda i, j: (0, j)),   # weight^T column tile
                pl.BlockSpec((1, tn), lambda i, j: (0, j)),   # bias tile
            ],
            out_specs=pl.BlockSpec((tm, tn), lambda i, j: (i, j)),
            scratch_shapes=[pltpu.VMEM((tm, D), w_t.dtype)],  # cached LayerNorm tile
        ),
        compiler_params=pltpu.CompilerParams(
            dimension_semantics=("parallel", "arbitrary"),
            vmem_limit_bytes=vmem_limit),
        cost_estimate=cost,
    )(x2d, gamma2, beta2, w_t, bias2)

    if out_cols != C:
        out2d = out2d[:, :C]                       # drop lane padding (narrow heads only)
    return out2d.reshape(*orig_shape[:-1], C)


def linear_module_forward(x, context_mask, params, *, eps=1e-5):
    # context_mask is unused by the original module's forward.
    del context_mask
    return linear_head_forward(x, params, eps=eps)


def reference_forward(x, gamma, beta, weight, bias, eps=1e-5):
    xf = x.astype(jnp.float32)
    mean = jnp.mean(xf, axis=-1, keepdims=True)
    var = jnp.mean((xf - mean) ** 2, axis=-1, keepdims=True)
    xn = (xf - mean) * jax.lax.rsqrt(var + eps)
    xn = xn * gamma + beta
    return xn @ weight.T.astype(jnp.float32) + bias


if __name__ == "__main__":
    key = jax.random.PRNGKey(0)
    B, S, D, C = 2, 8, 32, 4   # batch, seq, dim, num_classes

    kx, kw, kb, kw2, kb2 = jax.random.split(key, 5)
    x = jax.random.normal(kx, (B, S, D), dtype=jnp.float32)
    context_mask = jnp.ones((B, S), dtype=jnp.float32)  # unused by forward

    # Deterministic parameter init (LayerNorm default: gamma=1, beta=0).
    gamma = jnp.ones((D,), dtype=jnp.float32)
    beta = jnp.zeros((D,), dtype=jnp.float32)
    bound = 1.0 / (D ** 0.5)
    weight = jax.random.uniform(kw, (C, D), minval=-bound, maxval=bound,
                                dtype=jnp.float32)
    bias = jax.random.uniform(kb, (C,), minval=-bound, maxval=bound,
                              dtype=jnp.float32)

    ref = reference_forward(x, gamma, beta, weight, bias)

    # --- exact-precision path (f32 head weight) ---------------------------------------
    params_f32 = prepare_linear_params(gamma, beta, weight, bias,
                                       mxu_dtype=jnp.float32)
    out = jax.block_until_ready(linear_module_forward(x, context_mask, params_f32))
    assert out.shape == (B, S, C), out.shape
    assert jnp.allclose(out, ref, atol=1e-5, rtol=1e-5), "f32 path mismatch vs reference"

    # --- default bf16 (MXU-native) weight path ----------------------------------------
    params_bf16 = prepare_linear_params(gamma, beta, weight, bias)
    out_bf = jax.block_until_ready(linear_module_forward(x, context_mask, params_bf16))
    assert out_bf.shape == (B, S, C), out_bf.shape
    assert jnp.allclose(out_bf, ref, atol=5e-2, rtol=5e-2), "bf16 path outside tolerance"

    # --- wide head (C >= 128, not a multiple of tn): direct (M, C) output with a
    #     masked store on the final partial column tile --------------------------------
    C2 = 640
    weight2 = jax.random.uniform(kw2, (C2, D), minval=-bound, maxval=bound,
                                 dtype=jnp.float32)
    bias2 = jax.random.uniform(kb2, (C2,), minval=-bound, maxval=bound,
                               dtype=jnp.float32)
    params2 = prepare_linear_params(gamma, beta, weight2, bias2,
                                    mxu_dtype=jnp.float32)
    out2 = jax.block_until_ready(linear_head_forward(x, params2))
    ref2 = reference_forward(x, gamma, beta, weight2, bias2)
    assert out2.shape == (B, S, C2), out2.shape
    assert jnp.allclose(out2, ref2, atol=1e-5, rtol=1e-5), "wide-head path mismatch"

    print("KERNEL_OK")
</pallas_src>

<mosaic_0001>
module attributes {stable_mosaic.version = 11 : i64} {
  func.func @_ln_head_kernel(%arg0: i32, %arg1: i32, %arg2: memref<8x32xf32, #tpu.memory_space<vmem>>, %arg3: memref<1x32xf32, #tpu.memory_space<vmem>>, %arg4: memref<1x32xf32, #tpu.memory_space<vmem>>, %arg5: memref<32x128xf32, #tpu.memory_space<vmem>>, %arg6: memref<1x128xf32, #tpu.memory_space<vmem>>, %arg7: memref<8x128xf32, #tpu.memory_space<vmem>>, %arg8: memref<8x32xf32, #tpu.memory_space<vmem>>) attributes {dimension_semantics = [#tpu.dimension_semantics<parallel>, #tpu.dimension_semantics<arbitrary>], iteration_bounds = array<i64: 2, 1>, scalar_prefetch = 0 : i64, scratch_operands = 1 : i64, tpu.core_type = #tpu.core_type<tc>, window_params = [{transform_indices = @transform_0, window_bounds = array<i64: 8, 32>}, {pipeline_mode = #tpu.pipeline_mode<synchronous>, transform_indices = @transform_1, window_bounds = array<i64: 1, 32>}, {pipeline_mode = #tpu.pipeline_mode<synchronous>, transform_indices = @transform_2, window_bounds = array<i64: 1, 32>}, {transform_indices = @transform_3, window_bounds = array<i64: 32, 128>}, {transform_indices = @transform_4, window_bounds = array<i64: 1, 128>}, {transform_indices = @transform_5, window_bounds = array<i64: 8, 128>}]} {
    %c0_i32 = arith.constant 0 : i32
    %0 = arith.cmpi eq, %arg1, %c0_i32 : i32
    %1 = arith.extui %0 : i1 to i32
    %c0_i32_0 = arith.constant 0 : i32
    %2 = arith.cmpi ne, %1, %c0_i32_0 : i32
    scf.if %2 {
      %c0_8 = arith.constant 0 : index
      %c0_9 = arith.constant 0 : index
      %10 = vector.load %arg2[%c0_8, %c0_9] : memref<8x32xf32, #tpu.memory_space<vmem>>, vector<8x32xf32>
      %cst_10 = arith.constant dense<0.000000e+00> : vector<8xf32>
      %11 = vector.multi_reduction <add>, %10, %cst_10 [1] : vector<8x32xf32> to vector<8xf32>
      %12 = vector.shape_cast %11 : vector<8xf32> to vector<8x1xf32>
      %cst_11 = arith.constant 3.200000e+01 : f32
      %13 = vector.broadcast %cst_11 : f32 to vector<8x1xf32>
      %14 = arith.divf %12, %13 : vector<8x1xf32>
      %15 = vector.broadcast %14 : vector<8x1xf32> to vector<8x32xf32>
      %16 = arith.subf %10, %15 : vector<8x32xf32>
      %17 = arith.mulf %16, %16 : vector<8x32xf32>
      %cst_12 = arith.constant dense<0.000000e+00> : vector<8xf32>
      %18 = vector.multi_reduction <add>, %17, %cst_12 [1] : vector<8x32xf32> to vector<8xf32>
      %19 = vector.shape_cast %18 : vector<8xf32> to vector<8x1xf32>
      %cst_13 = arith.constant 3.200000e+01 : f32
      %20 = vector.broadcast %cst_13 : f32 to vector<8x1xf32>
      %21 = arith.divf %19, %20 : vector<8x1xf32>
      %cst_14 = arith.constant 9.99999974E-6 : f32
      %22 = vector.broadcast %cst_14 : f32 to vector<8x1xf32>
      %23 = arith.addf %21, %22 : vector<8x1xf32>
      %24 = math.rsqrt %23 : vector<8x1xf32>
      %25 = vector.broadcast %24 : vector<8x1xf32> to vector<8x32xf32>
      %26 = arith.mulf %16, %25 : vector<8x32xf32>
      %c0_15 = arith.constant 0 : index
      %c0_16 = arith.constant 0 : index
      %27 = vector.load %arg3[%c0_15, %c0_16] : memref<1x32xf32, #tpu.memory_space<vmem>>, vector<1x32xf32>
      %28 = vector.broadcast %27 : vector<1x32xf32> to vector<8x32xf32>
      %29 = arith.mulf %26, %28 : vector<8x32xf32>
      %c0_17 = arith.constant 0 : index
      %c0_18 = arith.constant 0 : index
      %30 = vector.load %arg4[%c0_17, %c0_18] : memref<1x32xf32, #tpu.memory_space<vmem>>, vector<1x32xf32>
      %31 = vector.broadcast %30 : vector<1x32xf32> to vector<8x32xf32>
      %32 = arith.addf %29, %31 : vector<8x32xf32>
      %c0_19 = arith.constant 0 : index
      %c0_20 = arith.constant 0 : index
      %33 = vector.load %arg8[%c0_19, %c0_20] : memref<8x32xf32, #tpu.memory_space<vmem>>, vector<8x32xf32>
      tpu.vector_store %arg8[%c0_19, %c0_20], %32 {strides = array<i32>} : memref<8x32xf32, #tpu.memory_space<vmem>>, vector<8x32xf32>,
    } else {
    }
    %c0 = arith.constant 0 : index
    %c0_1 = arith.constant 0 : index
    %3 = vector.load %arg8[%c0, %c0_1] : memref<8x32xf32, #tpu.memory_space<vmem>>, vector<8x32xf32>
    %c0_2 = arith.constant 0 : index
    %c0_3 = arith.constant 0 : index
    %4 = vector.load %arg5[%c0_2, %c0_3] : memref<32x128xf32, #tpu.memory_space<vmem>>, vector<32x128xf32>
    %cst = arith.constant dense<0.000000e+00> : vector<8x128xf32>
    %5 = tpu.matmul %3, %4, %cst {dimension_numbers = #tpu.dot_dimension_numbers<[1], [0], [0], [1], [0, 0, 1, 1], [], []>} : vector<8x32xf32>, vector<32x128xf32>, vector<8x128xf32> -> vector<8x128xf32>
    %c0_4 = arith.constant 0 : index
    %c0_5 = arith.constant 0 : index
    %6 = vector.load %arg6[%c0_4, %c0_5] : memref<1x128xf32, #tpu.memory_space<vmem>>, vector<1x128xf32>
    %7 = vector.broadcast %6 : vector<1x128xf32> to vector<8x128xf32>
    %8 = arith.addf %5, %7 : vector<8x128xf32>
    %c0_6 = arith.constant 0 : index
    %c0_7 = arith.constant 0 : index
    %9 = vector.load %arg7[%c0_6, %c0_7] : memref<8x128xf32, #tpu.memory_space<vmem>>, vector<8x128xf32>
    tpu.vector_store %arg7[%c0_6, %c0_7], %8 {strides = array<i32>} : memref<8x128xf32, #tpu.memory_space<vmem>>, vector<8x128xf32>,
    return
  }
  func.func @transform_0(%arg0: i32, %arg1: i32) -> (i32, i32) {
    %c0_i32 = arith.constant 0 : i32
    %c0_i32_0 = arith.constant 0 : i32
    return %arg0, %c0_i32 : i32, i32
  }
  func.func @transform_1(%arg0: i32, %arg1: i32) -> (i32, i32) {
    %c0_i32 = arith.constant 0 : i32
    %c0_i32_0 = arith.constant 0 : i32
    %c0_i32_1 = arith.constant 0 : i32
    return %c0_i32, %c0_i32_0 : i32, i32
  }
  func.func @transform_2(%arg0: i32, %arg1: i32) -> (i32, i32) {
    %c0_i32 = arith.constant 0 : i32
    %c0_i32_0 = arith.constant 0 : i32
    %c0_i32_1 = arith.constant 0 : i32
    return %c0_i32, %c0_i32_0 : i32, i32
  }
  func.func @transform_3(%arg0: i32, %arg1: i32) -> (i32, i32) {
    %c0_i32 = arith.constant 0 : i32
    %c0_i32_0 = arith.constant 0 : i32
    return %c0_i32, %arg1 : i32, i32
  }
  func.func @transform_4(%arg0: i32, %arg1: i32) -> (i32, i32) {
    %c0_i32 = arith.constant 0 : i32
    %c0_i32_0 = arith.constant 0 : i32
    return %c0_i32, %arg1 : i32, i32
  }
  func.func @transform_5(%arg0: i32, %arg1: i32) -> (i32, i32) {
    %c0_i32 = arith.constant 0 : i32
    return %arg0, %arg1 : i32, i32
  }
}

</mosaic_0001>

<bundles_post_ra>
// kernel: tpu_custom_call.1
= control target key start
LH: loop header
LB: loop body
LE: loop exit
PB: predicated region body
PF: predicated region fallthrough
CT: control target
= control target key end

     0   :  { %10 = vsyncpa [#allocation4], 0  ;;  %s1069_s0 = inlined_call_operand.hbm [shape: f32[16,32], index: 0, kind: input, shape index: {}]   ;;  %s1070_s1 = inlined_call_operand.vmem [shape: f32[1,32], index: 1, kind: input, shape index: {}]   ;;  %s1071_s2 = inlined_call_operand.vmem [shape: f32[1,32], index: 2, kind: input, shape index: {}]   ;;  %s1072_s3 = inlined_call_operand.hbm [shape: f32[32,128], index: 3, kind: input, shape index: {}]   ;;  %s1073_s4 = inlined_call_operand.vmem [shape: f32[1,128], index: 4, kind: input, shape index: {}]   ;;  %s1074_s5 = inlined_call_operand.hbm [shape: f32[16,128], index: 5, kind: output, shape index: {}]  }
   0x1   :  { %12 = vsyncpa [#allocation4 + $0x1], 0 }
   0x2   :  { %13 = vsyncpa [#allocation7], 0 }
   0x3   :  { %14 = vsyncpa [#allocation5], 0 }
   0x4   :  { %16 = vsyncpa [#allocation5 + $0x1], 0  ;;  %s838_s18 = smov 0   ;;  %s840_s19 = smov 0  }
   0x5   :  { %s842_s20 = smov 0   ;;  %s844_s21 = smov 0  }
   0x6   :  { %s846_s22 = smov 0   ;;  %s848_s23 = smov 0  }
   0x7 LB: > { %s532_s24 = sadd.s32 4294967295, %s798_s23   ;;  %s533_s25 = sadd.s32 4294967294, %s798_s23   ;;  %s798_s23 = sphi %s848_s23, %s22_s23   ;;  %s794_s22 = sphi %s846_s22, %s1098_s22   ;;  %s790_s21 = sphi %s844_s21, %s1097_s21   ;;  %s786_s20 = sphi %s842_s20, %s1096_s20   ;;  %s782_s19 = sphi %s840_s19, %s1095_s19   ;;  %s778_s18 = sphi %s838_s18, %s1094_s18  }
   0x8   : > { %p54_p0 = scmp.ne.s32.totalorder %s782_s19, %s778_s18  ;;  %p872_p1 = scmp.eq.s32.totalorder %s532_s24, 0 }
   0x9   : > { %p876_p2 = scmp.eq.s32.totalorder %s532_s24, 1  ;;  %p180_p3 = scmp.eq.s32.totalorder %s533_s25, 1 }
   0xa   : > { %s1079_s26 = scalar_select %p872_p1, 1, 0 }
   0xb   : > { %s1080_s27 = scalar_select %p876_p2, 1, 0 }
   0xc   : > { %p882_p4 = por %p872_p1, %p54_p0  ;;  %p534_p5 = scmp.ge.s32.totalorder %s798_s23, 1 }
   0xd   : > { %p887_p6 = por %p180_p3, %p54_p0  ;;  %p187_p7 = scmp.lt.s32.totalorder %s798_s23, 3 }
   0xe   : > { %s1081_s28 = scalar_select %p882_p4, 1, 0 }
   0xf   : > { %s1082_s29 = scalar_select %p887_p6, 1, 0 }
  0x10   : > { %p892_p8 = pnand %p534_p5, %p187_p7  ;;  %s800_s6 = smov [#allocation6]  }
  0x11   : > { %s207_s7 = sshll.u32 %s800_s6, 4  ;;  %s34_s9 = sadd.s32 1, %s794_s22  ;;  %s208_s7 = int_to_ptr.vmem [resolvable:$true] %s207_s7 }
  0x12   : > { %s1083_s30 = scalar_select %p892_p8, 1, 0 }
  0x13   : > { %p582_p9 = pneg %p892_p8  ;;  %s654_s12 = scalar_lea.hbm %s1072_s3, 512 }
  0x14   : > { %p655_p12 = scmp.ne.s32.totalorder %s1072_s3, %s654_s12  ;;  %p661_p5 = scmp.lt.u32.totalorder %s654_s12, %s1072_s3 }
  0x15   : > { %p901_p11 = pnand %p582_p9, %p872_p1 }
  0x17   : > { %p656_p13 = pneg %p901_p11 }
  0x19   : > { %p657_p0 = pnand %p656_p13, %p655_p12 }
  0x1b   : > { %p658_p3 = pneg %p657_p0 }
  0x1d   : > { %p663_p7 = pnand %p661_p5, %p658_p3 }
  0x1f   : > { %666 = shalt.err (!%p663_p7)
}
  0x20   : > { %s667_s17 = scalar_lea.vmem %s208_s7, 512  ;;  %p675_p1 = scmp.lt.s32.totalorder %s208_s7, %s208_s7 }
  0x21   : > { %p668_p9 = scmp.ne.s32.totalorder %s208_s7, %s667_s17  ;;  %p676_p4 = scmp.lt.s32.totalorder %s667_s17, %s667_s17 }
  0x23   : > { %p670_p10 = pnand %p668_p9, %p656_p13  ;;  %p677_p8 = por %p676_p4, %p675_p1 }
  0x25   : > { %p671_p6 = pneg %p670_p10 }
  0x27   : > { %p678_p2 = pnand %p677_p8, %p671_p6 }
  0x29   : > { %681 = shalt.err (!%p678_p2)
}
  0x2a   : > { %s801_s24 = smov 128   ;;  %s802_s25 = smov 8  }
  0x2b   : > { %585 = dma.hbm_to_vmem [thread:$0]  (!%p901_p11), %s1072_s3, 512, %s208_s7, [#allocation7], %s801_s24, %s801_s24, %s802_s25  }
  0x2c   : > { %p36_p1 = scmp.ge.s32.totalorder %s34_s9, 2  ;;  %s41_s11 = sadd.s32 1, %s786_s20 }
  0x2d   : > { %p48_p2 = scmp.ne.s32.totalorder %s786_s20, %s782_s19  ;;  %p49_p4 = scmp.eq.s32.totalorder %s798_s23, 0 }
  0x2e   : > { %s1100_s9 = smov (%p36_p1, %s34_s9), 0  ;;  %p1086_p8 = scmp.ne.s32.totalorder %s1080_s27, 0 }
  0x2f   : > { %p928_p6 = por %p49_p4, %p48_p2  ;;  %s38_s8 = ssub.s32 %s794_s22, %s1100_s9 }
  0x30   : > { %p934_p10 = por %p1086_p8, %p48_p2  ;;  %p595_p12 = scmp.lt.s32.totalorder %s798_s23, 2 }
  0x31   : > { %p39_p11 = scmp.eq.s32.totalorder %s38_s8, 0  ;;  %s227_s7 = sand.u32 1, %s786_s20  }
  0x32   : > { %s538_s14 = sshll.u32 %s227_s7, 3  ;;  %s539_s16 = sshll.u32 %s794_s22, 7 }
  0x33   : > { %s943_s15 = scalar_select %p39_p11, %s786_s20, %s41_s11  }
  0x34   : > { %s949_s25 = scalar_lea.hbm %s1069_s0, %s539_s16  ;;  %s231_s27 = scalar_lea.vmem [#allocation3], %s538_s14 }
  0x35   : > { %s238_s6 = sshll.u32 %s231_s27, 4  ;;  %p955_p13 = pnand %p595_p12, %p928_p6  ;;  %s951_s6 = int_to_ptr.vmem [resolvable:$true] %s238_s6 }
  0x36   : > { %s228_s11 = scalar_lea.sflag [#allocation4], %s227_s7  ;;  %s682_s8 = scalar_lea.hbm %s949_s25, 128 }
  0x37   : > { %p683_p0 = scmp.ne.s32.totalorder %s949_s25, %s682_s8  ;;  %p684_p3 = pneg %p955_p13 }
  0x38   : > { %s687_s17 = scalar_lea.hbm %s1069_s0, 256  ;;  %p688_p9 = scmp.lt.u32.totalorder %s949_s25, %s1069_s0 }
  0x39   : > { %p685_p5 = pnand %p684_p3, %p683_p0  ;;  %p689_p1 = scmp.lt.u32.totalorder %s687_s17, %s682_s8 }
  0x3a   : > { %p691_p4 = scmp.lt.u32.totalorder %s682_s8, %s949_s25 }
  0x3b   : > { %p686_p7 = pneg %p685_p5  ;;  %p690_p2 = por %p689_p1, %p688_p9 }
  0x3d   : > { %p692_p6 = por %p691_p4, %p690_p2 }
  0x3f   : > { %p693_p8 = pnand %p692_p6, %p686_p7 }
  0x41   : > { %696 = shalt.err (!%p693_p8)
}
  0x42   : > { %s697_s7 = scalar_lea.vmem %s951_s6, 128  ;;  %s803_s27 = smov [#allocation3]  }
  0x43   : > { %p698_p12 = scmp.ne.s32.totalorder %s951_s6, %s697_s7  ;;  %s702_s14 = sshll.u32 %s803_s27, 4  ;;  %s703_s14 = int_to_ptr.vmem [resolvable:$false] %s702_s14 }
  0x44   : > { %s704_s16 = scalar_lea.vmem %s703_s14, 256  ;;  %p705_p5 = scmp.lt.s32.totalorder %s951_s6, %s703_s14 }
  0x45   : > { %p700_p11 = pnand %p698_p12, %p684_p3  ;;  %p706_p9 = scmp.lt.s32.totalorder %s704_s16, %s697_s7 }
  0x47   : > { %p701_p0 = pneg %p700_p11  ;;  %p707_p1 = por %p706_p9, %p705_p5 }
  0x49   : > { %p708_p2 = pnand %p707_p1, %p701_p0 }
  0x4b   : > { %711 = shalt.err (!%p708_p2)
}
  0x4c   : > { %589 = dma.hbm_to_vmem [thread:$0]  (!%p955_p13), %s949_s25, 128, %s951_s6, %s228_s11  }
  0x4d   : > { %p1089_p7 = scmp.ne.s32.totalorder %s1083_s30, 0 }
  0x4e   : > { %s987_s8 = sand.u32 (!%p1089_p7), 1, %s782_s19   ;;  %p1090_p3 = scmp.ne.s32.totalorder (!%p1089_p7), %s1081_s28, 0 }
  0x4f   : > { %247 = sbr.rel (%p1089_p7) target bundleno = 640 (0x280), region = 40  ;;  %s541_s17 = sshll.u32 (!%p1089_p7), %s987_s8, 3 }
  0x50   : > { %s250_s12 = scalar_lea.sflag (!%p1089_p7), [#allocation4], %s987_s8  ;;  %s253_s24 = scalar_lea.vmem (!%p1089_p7), [#allocation3], %s541_s17 }
  0x56   : > { %765 = dma.done.wait (%p1090_p3), %s250_s12, 128  }
  0x57   : > { %767 = vsyncadd (%p1090_p3), %s250_s12, 4294967168  ;;  %p1091_p13 = scmp.ne.s32.totalorder %s1079_s26, 0 }
  0x59   : > { %769 = dma.done.wait (%p1091_p13), [#allocation7], 512  }
  0x5a   : > { %771 = vsyncadd (%p1091_p13), [#allocation7], 4294966784  ;;  %vm295_vm0 = vcmask 261120   ;;  %v294_v0 = vld [vmem:[%s253_s24] sm:$0xff]  ;;  %v328_v7 = vld [vmem:[#allocation6] sm:$0xff]  ;;  %v804_v10 = vmov 0.0|0.0  }
  0x5b   : > { %v296_v1 = vsel %vm295_vm0, %v294_v0, 0.0  ;;  %v329_v8 = vld [vmem:[#allocation6 + $0x8] sm:$0xff]  ;;  %568 = vmatprep.subr.bf16.mxu0 %v804_v10  ;;  %v330_v11 = vld [vmem:[#allocation6 + $0x10] sm:$0xff]  ;;  %v331_v12 = vld [vmem:[#allocation6 + $0x18] sm:$0xff]  ;;  %vm805_vm1 = vmmov 0   ;;  %v806_v14 = vmov 0.0  }
  0x5c   : > { %297 = vadd.xlane.f32.xlu0 %v296_v1  ;;  %v569_v9 = vpack.c.bf16 %v329_v8, %v328_v7  ;;  %v572_v13 = vpack.c.bf16 %v331_v12, %v330_v11  ;;  %565 = vmatprep.mubr.msk.f32.mxu0 %vm805_vm1, %v806_v14  ;;  %v544_v19 = vld [vmem:[%s1070_s1] ss:$0 sm:$0xff]  ;;  %s549_s11 = sshll.u32 %s790_s21, 7  ;;  %s286_s7 = scalar_lea.vmem [#allocation8], %s541_s17 }
  0x5d   : > { %v545_v21 = vld [vmem:[%s1071_s2] ss:$0 sm:$0xff]  ;;  %s429_s27 = sshll.u32 %s286_s7, 4  ;;  %s1020_s12 = scalar_lea.hbm %s1074_s5, %s549_s11  ;;  %s1022_s27 = int_to_ptr.vmem [resolvable:$true] %s429_s27 }
  0x5e   : > { %570 = vmatpush3.bf16.msra.mxu0 %v569_v9  ;;  %v546_v25 = vld [vmem:[%s1073_s4] ss:$0 sm:$0xff]  ;;  %s415_s24 = scalar_lea.sflag [#allocation5], %s987_s8  ;;  %s712_s26 = scalar_lea.vmem %s1022_s27, 128 }
  0x5f   : > { %571 = vmatprep.subr.bf16.mxu0 %v804_v10  ;;  %p713_p4 = scmp.ne.s32.totalorder %s1022_s27, %s712_s26  ;;  %s807_s21 = smov [#allocation8]  }
  0x60   : > { %s716_s17 = sshll.u32 %s807_s21, 4  ;;  %s717_s17 = int_to_ptr.vmem [resolvable:$false] %s716_s17 }
  0x61   : > { %p714_p6 = pnand %p713_p4, %p934_p10  ;;  %s718_s28 = scalar_lea.vmem %s717_s17, 256 }
  0x62   : > { %573 = vmatpush3.bf16.msra.mxu0 %v572_v13  ;;  %p719_p12 = scmp.lt.s32.totalorder %s1022_s27, %s717_s17  ;;  %p720_p11 = scmp.lt.s32.totalorder %s718_s28, %s712_s26 }
  0x63   : > { %p715_p8 = pneg %p714_p6 }
  0x64   : > { %p721_p0 = por %p720_p11, %p719_p12 }
  0x66   : > { %p722_p5 = pnand %p721_p0, %p715_p8 }
  0xe9   : > { %v298_v2 = vpop.xlane.xlu0 %297 }
  0xea   : > { %v300_v3 = vmul.f32 0.03125, %v298_v2 }
  0xec   : > { %v301_v4 = vsub.f32 %v294_v0, %v300_v3 }
  0xee   : > { %v302_v5 = vmul.f32 %v301_v4, %v301_v4 }
  0xf0   : > { %v303_v6 = vsel %vm295_vm0, %v302_v5, 0.0 }
  0xf1   : > { %304 = vadd.xlane.f32.xlu0 %v303_v6 }
 0x17e   : > { %v305_v15 = vpop.xlane.xlu0 %304 }
 0x17f   : > { %v306_v16 = vmul.f32 0.03125, %v305_v15 }
 0x181   : > { %v307_v17 = vadd.f32 1e-05, %v306_v16 }
 0x183   : > { %652 = vrsqrt.f32 %v307_v17 }
 0x18d   : > { %v653_v18 = vpop.eup %652 }
 0x18e   : > { %v309_v20 = vmul.f32 %v653_v18, %v301_v4 }
 0x190   : > { %v317_v22 = vmul.f32 %v544_v19, %v309_v20 }
 0x192   : > { %v325_v23 = vadd.f32 %v545_v21, %v317_v22 }
 0x194   : > { %326 = vst.msk [vmem:[#allocation2] sm:$0xff] %vm295_vm0, %v325_v23 }
 0x19b   : > { %v327_v24 = vld [vmem:[#allocation2] sm:$0xff] }
 0x19c   : > { %566 = vmatmul.mubr.msk.f32.vlgmr.msra.gmra.mrb[0].mxu0 %vm295_vm0, %v327_v24 }
 0x26f   : > { %v409_v26 = vpop.f32.mrb[0].mxu0 }
 0x270   : > { %v410_v27 = vadd.f32 %v546_v25, %v409_v26  ;;  %v567_v28 = vpop.f32.mrb[1].mxu0 }
 0x272   : > { %413 = vst [vmem:[%s286_s7] sm:$0xff] %v410_v27 }
 0x273   : > { %725 = shalt.err (!%p722_p5)
}
 0x274   : > { %s726_s8 = scalar_lea.hbm %s1020_s12, 128  ;;  %s730_s6 = scalar_lea.hbm %s1074_s5, 256 }
 0x275   : > { %p727_p9 = scmp.ne.s32.totalorder %s1020_s12, %s726_s8  ;;  %p731_p7 = scmp.lt.u32.totalorder %s1020_s12, %s1074_s5 }
 0x276   : > { %p732_p3 = scmp.lt.u32.totalorder %s730_s6, %s726_s8  ;;  %p734_p4 = scmp.lt.u32.totalorder %s726_s8, %s1020_s12 }
 0x277   : > { %p728_p1 = pnand %p727_p9, %p934_p10 }
 0x278   : > { %p733_p13 = por %p732_p3, %p731_p7 }
 0x279   : > { %p729_p2 = pneg %p728_p1 }
 0x27a   : > { %p735_p6 = por %p734_p4, %p733_p13 }
 0x27c   : > { %p736_p8 = pnand %p735_p6, %p729_p2 }
 0x27e   : > { %739 = shalt.err (!%p736_p8)
}
 0x27f   : > { %580 = dma.vmem_to_hbm [thread:$0]  (%p934_p10), %s1022_s27, 128, %s1020_s12, %s415_s24  }
 0x280 PF: > { %s441_s7 = sand.u32 1, %s778_s18   ;;  %p1092_p12 = scmp.ne.s32.totalorder %s1082_s29, 0 }
 0x281   : > { %p1093_p11 = scmp.ge.s32.totalorder %s798_s23, 2  ;;  %s442_s14 = scalar_lea.sflag [#allocation5], %s441_s7 }
 0x283   : > { %p591_p0 = pnand %p1093_p11, %p1092_p12 }
 0x285   : > { %773 = dma.done.wait (!%p591_p0), %s442_s14, 128  }
 0x286   : > { %775 = vsyncadd (!%p591_p0), %s442_s14, 4294967168  ;;  %s22_s23 = sadd.s32 1, %s798_s23   ;;  %s1094_s18 = smov %s782_s19 }
 0x287   : > { %p19_p5 = scmp.ge.s32.totalorder %s22_s23, 4   ;;  %s1095_s19 = smov %s786_s20 }
 0x288   : > { %s1096_s20 = smov %s943_s15  ;;  %s1097_s21 = smov %s794_s22 }
 0x289   : > { %s1098_s22 = smov %s1100_s9  ;;  %21 = sbr.rel (!%p19_p5) target bundleno = 7 (0x7), region = 97 }
 0x290   :  { %447 = vsyncpa [#allocation4], 1 }
 0x291   :  { %449 = vsyncpa [#allocation4 + $0x1], 1 }
 0x292   :  { %450 = vsyncpa [#allocation7], 1 }
 0x293   :  { %451 = vsyncpa [#allocation5], 1 }
 0x294   :  { %453 = vsyncpa [#allocation5 + $0x1], 1 }

</bundles_post_ra>
